<compile_context>
chip_gen: v6e
topology: v6e:2x2x1
jax: 0.10.0
libtpu: 0.0.40
codegen_flags: <defaults>
</compile_context>

<pallas_src>
import jax
import jax.numpy as jnp
from jax import lax
from jax.experimental import pallas as pl
from jax.experimental.pallas import tpu as pltpu


LANE = 128  # TPU vreg lane width
SUBLANE = 8  # TPU vreg sublane count


def _round_up(n: int, m: int) -> int:
    return ((n + m - 1) // m) * m


def make_mlp_kernel(n_layer: int):
    """Pallas kernel computing the whole MLP forward for one batch tile."""

    def mlp_kernel(x_ref, w_in_ref, b_in_ref, w_h_ref, b_h_ref,
                   w_out_ref, b_out_ref, o_ref):
        # input layer + ReLU (K = natural n_feature; MXU handles small K)
        h = jnp.dot(x_ref[...], w_in_ref[...],
                    preferred_element_type=jnp.float32) + b_in_ref[...]
        h = jnp.maximum(h, 0.0)

        # Hoist the shared hidden weight / bias loads out of the unrolled loop
        # (avoids n_layer redundant loads; broadcast_in_dim is not CSE'd).
        w_h = w_h_ref[...]
        b_h = b_h_ref[...]

        # n_layer x (hidden layer + ReLU) with the same shared weight,
        # matching the PyTorch module (self.hidden applied layernum times).
        def body(_, h):
            h = jnp.dot(h, w_h, preferred_element_type=jnp.float32) + b_h
            return jnp.maximum(h, 0.0)

        h = lax.fori_loop(0, n_layer, body, h, unroll=True)

        # output layer (no activation); lane-dense (padded-to-128) store.
        o_ref[...] = (jnp.dot(h, w_out_ref[...],
                              preferred_element_type=jnp.float32)
                      + b_out_ref[...]).astype(o_ref.dtype)

    return mlp_kernel


def init_params(key, n_feature, n_hidden, n_output):
    """PyTorch-style nn.Linear init: U(-1/sqrt(fan_in), 1/sqrt(fan_in)).
    Weights kept in PyTorch layout (out_features, in_features)."""
    ks = jax.random.split(key, 6)

    def lin(kw, kb, fan_in, fan_out):
        bound = 1.0 / jnp.sqrt(jnp.float32(fan_in))
        w = jax.random.uniform(kw, (fan_out, fan_in), jnp.float32,
                               minval=-bound, maxval=bound)
        b = jax.random.uniform(kb, (fan_out,), jnp.float32,
                               minval=-bound, maxval=bound)
        return w, b

    w_in, b_in = lin(ks[0], ks[1], n_feature, n_hidden)
    w_h, b_h = lin(ks[2], ks[3], n_hidden, n_hidden)
    w_out, b_out = lin(ks[4], ks[5], n_hidden, n_output)
    return dict(w_in=w_in, b_in=b_in, w_h=w_h, b_h=b_h,
                w_out=w_out, b_out=b_out)


def prepare_params(params):
    """One-time param prep: transpose weights to (in, out) layout and zero-pad
    the hidden/output dims to multiples of 128 lanes.  The input-feature dim
    of w_in is left at its natural size so x needs no feature padding.  Zero
    padding guarantees pad lanes stay exactly 0 through bias-add + ReLU."""
    n_hidden, n_feature = params["w_in"].shape
    n_output = params["w_out"].shape[0]
    hp = _round_up(n_hidden, LANE)
    op = _round_up(n_output, LANE)

    def pad2(a, rows, cols):
        z = jnp.zeros((rows, cols), jnp.float32)
        return z.at[:a.shape[0], :a.shape[1]].set(a.astype(jnp.float32))

    return dict(
        w_in=pad2(params["w_in"].T, n_feature, hp),   # (F, Hp)  no row pad
        b_in=pad2(params["b_in"][None, :], 1, hp),
        w_h=pad2(params["w_h"].T, hp, hp),            # (Hp, Hp)
        b_h=pad2(params["b_h"][None, :], 1, hp),
        w_out=pad2(params["w_out"].T, hp, op),        # (Hp, Op)
        b_out=pad2(params["b_out"][None, :], 1, op),
        n_feature=n_feature,
        n_output=n_output,
    )
    # TODO(synk): for large hidden dims (e.g. ~3000), cast resident weights to
    # bf16 (keep f32 accumulation) and set vmem_limit_bytes to fit v7x's
    # 64 MiB VMEM; skipped here so the f32 tolerance check stays tight.


def net_forward(x, prepared, n_layer: int, *, block_batch: int = 256):
    """Batch-tiled Pallas forward. Weights stay resident in VMEM across the
    batch grid (constant index_map)."""
    batch, n_feature = x.shape
    assert n_feature == prepared["n_feature"]
    hp = prepared["w_h"].shape[0]
    op = prepared["w_out"].shape[1]
    n_output = prepared["n_output"]

    # Balanced batch tiling: split into cdiv(b8, block_batch) tiles of equal,
    # sublane-aligned size so a ragged batch wastes <= 7 rows per tile.
    b8 = _round_up(batch, SUBLANE)
    num_tiles = pl.cdiv(b8, block_batch)
    tb = _round_up(pl.cdiv(b8, num_tiles), SUBLANE)
    bp = tb * num_tiles

    x_f32 = x.astype(jnp.float32)
    x_p = x_f32 if bp == batch else jnp.pad(x_f32, ((0, bp - batch), (0, 0)))

    kernel = make_mlp_kernel(n_layer)

    out = pl.pallas_call(
        kernel,
        out_shape=jax.ShapeDtypeStruct((bp, op), jnp.float32),
        grid=(num_tiles,),
        in_specs=[
            # x: tiled over batch, natural (unpadded) feature width.
            pl.BlockSpec((tb, n_feature), lambda i: (i, 0)),
            pl.BlockSpec((n_feature, hp), lambda i: (0, 0)),  # w_in resident
            pl.BlockSpec((1, hp), lambda i: (0, 0)),          # b_in resident
            pl.BlockSpec((hp, hp), lambda i: (0, 0)),         # w_h  resident
            pl.BlockSpec((1, hp), lambda i: (0, 0)),          # b_h  resident
            pl.BlockSpec((hp, op), lambda i: (0, 0)),         # w_out resident
            pl.BlockSpec((1, op), lambda i: (0, 0)),          # b_out resident
        ],
        out_specs=pl.BlockSpec((tb, op), lambda i: (i, 0)),
        compiler_params=pltpu.CompilerParams(
            dimension_semantics=("parallel",)),
    )(x_p, prepared["w_in"], prepared["b_in"], prepared["w_h"],
      prepared["b_h"], prepared["w_out"], prepared["b_out"])

    return out[:batch, :n_output]


def reference_forward(x, params, n_layer):
    """Pure-JAX reference reproducing PyTorch semantics (y = x @ W.T + b)."""
    h = jnp.maximum(x @ params["w_in"].T + params["b_in"], 0.0)
    for _ in range(n_layer):
        h = jnp.maximum(h @ params["w_h"].T + params["b_h"], 0.0)
    return h @ params["w_out"].T + params["b_out"]


if __name__ == "__main__":
    # Small shapes consistent with the module's forward.
    batch, n_feature, n_hidden, n_output, n_layer = 8, 16, 32, 4, 3

    key = jax.random.PRNGKey(0)
    k_x, k_p, k_x2 = jax.random.split(key, 3)
    x = jax.random.normal(k_x, (batch, n_feature), jnp.float32)
    params = init_params(k_p, n_feature, n_hidden, n_output)
    prepared = prepare_params(params)  # one-time transpose + pad

    # Small-batch run (single grid step).
    y = jax.block_until_ready(net_forward(x, prepared, n_layer))
    y_ref = reference_forward(x, params, n_layer)
    assert y.shape == (batch, n_output)
    assert jnp.allclose(y, y_ref, atol=2e-5, rtol=2e-5), "mismatch (small batch)"

    # Larger ragged batch: exercises balanced batch tiling (2 tiles of 152)
    # with resident weights and padded tail rows.
    batch2 = 300
    x2 = jax.random.normal(k_x2, (batch2, n_feature), jnp.float32)
    y2 = jax.block_until_ready(net_forward(x2, prepared, n_layer))
    y2_ref = reference_forward(x2, params, n_layer)
    assert y2.shape == (batch2, n_output)
    assert jnp.allclose(y2, y2_ref, atol=2e-5, rtol=2e-5), "mismatch (gridded batch)"

    print("KERNEL_OK")
</pallas_src>

<mosaic_0001>
module attributes {stable_mosaic.version = 11 : i64} {
  func.func @mlp_kernel(%arg0: i32, %arg1: memref<8x16xf32, #tpu.memory_space<vmem>>, %arg2: memref<16x128xf32, #tpu.memory_space<vmem>>, %arg3: memref<1x128xf32, #tpu.memory_space<vmem>>, %arg4: memref<128x128xf32, #tpu.memory_space<vmem>>, %arg5: memref<1x128xf32, #tpu.memory_space<vmem>>, %arg6: memref<128x128xf32, #tpu.memory_space<vmem>>, %arg7: memref<1x128xf32, #tpu.memory_space<vmem>>, %arg8: memref<8x128xf32, #tpu.memory_space<vmem>>) attributes {dimension_semantics = [#tpu.dimension_semantics<parallel>], iteration_bounds = array<i64: 1>, scalar_prefetch = 0 : i64, scratch_operands = 0 : i64, tpu.core_type = #tpu.core_type<tc>, window_params = [{transform_indices = @transform_0, window_bounds = array<i64: 8, 16>}, {pipeline_mode = #tpu.pipeline_mode<synchronous>, transform_indices = @transform_1, window_bounds = array<i64: 16, 128>}, {pipeline_mode = #tpu.pipeline_mode<synchronous>, transform_indices = @transform_2, window_bounds = array<i64: 1, 128>}, {pipeline_mode = #tpu.pipeline_mode<synchronous>, transform_indices = @transform_3, window_bounds = array<i64: 128, 128>}, {pipeline_mode = #tpu.pipeline_mode<synchronous>, transform_indices = @transform_4, window_bounds = array<i64: 1, 128>}, {pipeline_mode = #tpu.pipeline_mode<synchronous>, transform_indices = @transform_5, window_bounds = array<i64: 128, 128>}, {pipeline_mode = #tpu.pipeline_mode<synchronous>, transform_indices = @transform_6, window_bounds = array<i64: 1, 128>}, {transform_indices = @transform_7, window_bounds = array<i64: 8, 128>}]} {
    %c0 = arith.constant 0 : index
    %c0_0 = arith.constant 0 : index
    %0 = vector.load %arg1[%c0, %c0_0] : memref<8x16xf32, #tpu.memory_space<vmem>>, vector<8x16xf32>
    %c0_1 = arith.constant 0 : index
    %c0_2 = arith.constant 0 : index
    %1 = vector.load %arg2[%c0_1, %c0_2] : memref<16x128xf32, #tpu.memory_space<vmem>>, vector<16x128xf32>
    %cst = arith.constant dense<0.000000e+00> : vector<8x128xf32>
    %2 = tpu.matmul %0, %1, %cst {dimension_numbers = #tpu.dot_dimension_numbers<[1], [0], [0], [1], [0, 0, 1, 1], [], []>} : vector<8x16xf32>, vector<16x128xf32>, vector<8x128xf32> -> vector<8x128xf32>
    %c0_3 = arith.constant 0 : index
    %c0_4 = arith.constant 0 : index
    %3 = vector.load %arg3[%c0_3, %c0_4] : memref<1x128xf32, #tpu.memory_space<vmem>>, vector<1x128xf32>
    %4 = vector.broadcast %3 : vector<1x128xf32> to vector<8x128xf32>
    %5 = arith.addf %2, %4 : vector<8x128xf32>
    %cst_5 = arith.constant 0.000000e+00 : f32
    %6 = vector.broadcast %cst_5 : f32 to vector<8x128xf32>
    %7 = arith.maximumf %5, %6 : vector<8x128xf32>
    %c0_6 = arith.constant 0 : index
    %c0_7 = arith.constant 0 : index
    %8 = vector.load %arg4[%c0_6, %c0_7] : memref<128x128xf32, #tpu.memory_space<vmem>>, vector<128x128xf32>
    %c0_8 = arith.constant 0 : index
    %c0_9 = arith.constant 0 : index
    %9 = vector.load %arg5[%c0_8, %c0_9] : memref<1x128xf32, #tpu.memory_space<vmem>>, vector<1x128xf32>
    %c0_i32 = arith.constant 0 : i32
    %cst_10 = arith.constant dense<0.000000e+00> : vector<8x128xf32>
    %10 = tpu.matmul %7, %8, %cst_10 {dimension_numbers = #tpu.dot_dimension_numbers<[1], [0], [0], [1], [0, 0, 1, 1], [], []>} : vector<8x128xf32>, vector<128x128xf32>, vector<8x128xf32> -> vector<8x128xf32>
    %11 = vector.broadcast %9 : vector<1x128xf32> to vector<8x128xf32>
    %12 = arith.addf %10, %11 : vector<8x128xf32>
    %cst_11 = arith.constant 0.000000e+00 : f32
    %13 = vector.broadcast %cst_11 : f32 to vector<8x128xf32>
    %14 = arith.maximumf %12, %13 : vector<8x128xf32>
    %c1_i32 = arith.constant 1 : i32
    %cst_12 = arith.constant dense<0.000000e+00> : vector<8x128xf32>
    %15 = tpu.matmul %14, %8, %cst_12 {dimension_numbers = #tpu.dot_dimension_numbers<[1], [0], [0], [1], [0, 0, 1, 1], [], []>} : vector<8x128xf32>, vector<128x128xf32>, vector<8x128xf32> -> vector<8x128xf32>
    %16 = vector.broadcast %9 : vector<1x128xf32> to vector<8x128xf32>
    %17 = arith.addf %15, %16 : vector<8x128xf32>
    %cst_13 = arith.constant 0.000000e+00 : f32
    %18 = vector.broadcast %cst_13 : f32 to vector<8x128xf32>
    %19 = arith.maximumf %17, %18 : vector<8x128xf32>
    %c2_i32 = arith.constant 2 : i32
    %cst_14 = arith.constant dense<0.000000e+00> : vector<8x128xf32>
    %20 = tpu.matmul %19, %8, %cst_14 {dimension_numbers = #tpu.dot_dimension_numbers<[1], [0], [0], [1], [0, 0, 1, 1], [], []>} : vector<8x128xf32>, vector<128x128xf32>, vector<8x128xf32> -> vector<8x128xf32>
    %21 = vector.broadcast %9 : vector<1x128xf32> to vector<8x128xf32>
    %22 = arith.addf %20, %21 : vector<8x128xf32>
    %cst_15 = arith.constant 0.000000e+00 : f32
    %23 = vector.broadcast %cst_15 : f32 to vector<8x128xf32>
    %24 = arith.maximumf %22, %23 : vector<8x128xf32>
    %c0_16 = arith.constant 0 : index
    %c0_17 = arith.constant 0 : index
    %25 = vector.load %arg6[%c0_16, %c0_17] : memref<128x128xf32, #tpu.memory_space<vmem>>, vector<128x128xf32>
    %cst_18 = arith.constant dense<0.000000e+00> : vector<8x128xf32>
    %26 = tpu.matmul %24, %25, %cst_18 {dimension_numbers = #tpu.dot_dimension_numbers<[1], [0], [0], [1], [0, 0, 1, 1], [], []>} : vector<8x128xf32>, vector<128x128xf32>, vector<8x128xf32> -> vector<8x128xf32>
    %c0_19 = arith.constant 0 : index
    %c0_20 = arith.constant 0 : index
    %27 = vector.load %arg7[%c0_19, %c0_20] : memref<1x128xf32, #tpu.memory_space<vmem>>, vector<1x128xf32>
    %28 = vector.broadcast %27 : vector<1x128xf32> to vector<8x128xf32>
    %29 = arith.addf %26, %28 : vector<8x128xf32>
    %c0_21 = arith.constant 0 : index
    %c0_22 = arith.constant 0 : index
    %30 = vector.load %arg8[%c0_21, %c0_22] : memref<8x128xf32, #tpu.memory_space<vmem>>, vector<8x128xf32>
    tpu.vector_store %arg8[%c0_21, %c0_22], %29 {strides = array<i32>} : memref<8x128xf32, #tpu.memory_space<vmem>>, vector<8x128xf32>,
    return
  }
  func.func @transform_0(%arg0: i32) -> (i32, i32) {
    %c0_i32 = arith.constant 0 : i32
    %c0_i32_0 = arith.constant 0 : i32
    return %arg0, %c0_i32 : i32, i32
  }
  func.func @transform_1(%arg0: i32) -> (i32, i32) {
    %c0_i32 = arith.constant 0 : i32
    %c0_i32_0 = arith.constant 0 : i32
    %c0_i32_1 = arith.constant 0 : i32
    return %c0_i32, %c0_i32_0 : i32, i32
  }
  func.func @transform_2(%arg0: i32) -> (i32, i32) {
    %c0_i32 = arith.constant 0 : i32
    %c0_i32_0 = arith.constant 0 : i32
    %c0_i32_1 = arith.constant 0 : i32
    return %c0_i32, %c0_i32_0 : i32, i32
  }
  func.func @transform_3(%arg0: i32) -> (i32, i32) {
    %c0_i32 = arith.constant 0 : i32
    %c0_i32_0 = arith.constant 0 : i32
    %c0_i32_1 = arith.constant 0 : i32
    return %c0_i32, %c0_i32_0 : i32, i32
  }
  func.func @transform_4(%arg0: i32) -> (i32, i32) {
    %c0_i32 = arith.constant 0 : i32
    %c0_i32_0 = arith.constant 0 : i32
    %c0_i32_1 = arith.constant 0 : i32
    return %c0_i32, %c0_i32_0 : i32, i32
  }
  func.func @transform_5(%arg0: i32) -> (i32, i32) {
    %c0_i32 = arith.constant 0 : i32
    %c0_i32_0 = arith.constant 0 : i32
    %c0_i32_1 = arith.constant 0 : i32
    return %c0_i32, %c0_i32_0 : i32, i32
  }
  func.func @transform_6(%arg0: i32) -> (i32, i32) {
    %c0_i32 = arith.constant 0 : i32
    %c0_i32_0 = arith.constant 0 : i32
    %c0_i32_1 = arith.constant 0 : i32
    return %c0_i32, %c0_i32_0 : i32, i32
  }
  func.func @transform_7(%arg0: i32) -> (i32, i32) {
    %c0_i32 = arith.constant 0 : i32
    %c0_i32_0 = arith.constant 0 : i32
    return %arg0, %c0_i32 : i32, i32
  }
}

</mosaic_0001>

<bundles_post_ra>
// kernel: tpu_custom_call.1
= control target key start
LH: loop header
LB: loop body
LE: loop exit
PB: predicated region body
PF: predicated region fallthrough
CT: control target
= control target key end

     0   :  { %12 = vsyncpa [#allocation3], 0  ;;  %s1069_s0 = inlined_call_operand.hbm [shape: f32[8,16], index: 0, kind: input, shape index: {}]   ;;  %s1070_s1 = inlined_call_operand.hbm [shape: f32[16,128], index: 1, kind: input, shape index: {}]   ;;  %s1071_s2 = inlined_call_operand.vmem [shape: f32[1,128], index: 2, kind: input, shape index: {}]   ;;  %s1072_s3 = inlined_call_operand.hbm [shape: f32[128,128], index: 3, kind: input, shape index: {}]   ;;  %s1073_s4 = inlined_call_operand.vmem [shape: f32[1,128], index: 4, kind: input, shape index: {}]   ;;  %s1074_s5 = inlined_call_operand.hbm [shape: f32[128,128], index: 5, kind: input, shape index: {}]   ;;  %s1075_s6 = inlined_call_operand.vmem [shape: f32[1,128], index: 6, kind: input, shape index: {}]   ;;  %s1076_s7 = inlined_call_operand.hbm [shape: f32[8,128], index: 7, kind: output, shape index: {}]  }
   0x1   :  { %13 = vsyncpa [#allocation6], 0 }
   0x2   :  { %14 = vsyncpa [#allocation9], 0 }
   0x3   :  { %15 = vsyncpa [#allocation4], 0  ;;  %s851_s24 = smov [#allocation5]  }
   0x4   :  { %s31_s25 = sshll.u32 %s851_s24, 4  ;;  %s32_s25 = int_to_ptr.vmem [resolvable:$true] %s31_s25 }
   0x5   :  { %s751_s26 = scalar_lea.vmem %s32_s25, 256  ;;  %p756_p1 = scmp.lt.s32.totalorder %s32_s25, %s32_s25 }
   0x6   :  { %p752_p0 = scmp.ne.s32.totalorder %s32_s25, %s751_s26  ;;  %p757_p2 = scmp.lt.s32.totalorder %s751_s26, %s751_s26 }
   0x8   :  { %p758_p3 = por %p757_p2, %p756_p1 }
   0xa   :  { %p759_p4 = pnand %p758_p3, %p752_p0 }
   0xc   :  { %762 = shalt.err (!%p759_p4)
}
   0xd   :  { %s852_s27 = smov 128   ;;  %s853_s28 = smov 8  }
   0xe   :  { %37 = dma.hbm_to_vmem [thread:$0]  %s1070_s1, 256, %s32_s25, [#allocation6], %s852_s27, %s852_s27, %s853_s28  }
   0xf   :  { %s854_s8 = smov [#allocation2]   ;;  %s855_s10 = smov [#allocation7]  }
  0x10   :  { %s22_s9 = sshll.u32 %s854_s8, 4  ;;  %s45_s11 = sshll.u32 %s855_s10, 4  ;;  %s23_s9 = int_to_ptr.vmem [resolvable:$true] %s22_s9  ;;  %s46_s11 = int_to_ptr.vmem [resolvable:$true] %s45_s11 }
  0x11   :  { %s771_s12 = scalar_lea.vmem %s23_s9, 128  ;;  %p776_p6 = scmp.lt.s32.totalorder %s23_s9, %s23_s9 }
  0x12   :  { %p772_p5 = scmp.ne.s32.totalorder %s23_s9, %s771_s12  ;;  %p777_p7 = scmp.lt.s32.totalorder %s771_s12, %s771_s12 }
  0x14   :  { %p778_p8 = por %p777_p7, %p776_p6 }
  0x16   :  { %p779_p9 = pnand %p778_p8, %p772_p5 }
  0x18   :  { %782 = shalt.err (!%p779_p9)
}
  0x19   :  { %25 = dma.hbm_to_vmem [thread:$0]  %s1069_s0, 128, %s23_s9, [#allocation3]  }
  0x1a   :  { %s791_s15 = scalar_lea.vmem %s46_s11, 2048  ;;  %p796_p11 = scmp.lt.s32.totalorder %s46_s11, %s46_s11 }
  0x1b   :  { %p792_p10 = scmp.ne.s32.totalorder %s46_s11, %s791_s15  ;;  %p797_p12 = scmp.lt.s32.totalorder %s791_s15, %s791_s15 }
  0x1d   :  { %p798_p13 = por %p797_p12, %p796_p11 }
  0x1f   :  { %p799_p0 = pnand %p798_p13, %p792_p10 }
  0x21   :  { %802 = shalt.err (!%p799_p0)
}
  0x22   :  { %51 = dma.hbm_to_vmem [thread:$0]  %s1072_s3, 2048, %s46_s11, [#allocation6], %s852_s27, %s852_s27, %s853_s28  }
  0x23   :  { %s856_s17 = smov [#allocation8]  }
  0x24   :  { %s59_s18 = sshll.u32 %s856_s17, 4  ;;  %s60_s18 = int_to_ptr.vmem [resolvable:$true] %s59_s18 }
  0x25   :  { %s811_s19 = scalar_lea.vmem %s60_s18, 2048  ;;  %p816_p2 = scmp.lt.s32.totalorder %s60_s18, %s60_s18 }
  0x26   :  { %p812_p1 = scmp.ne.s32.totalorder %s60_s18, %s811_s19  ;;  %p817_p3 = scmp.lt.s32.totalorder %s811_s19, %s811_s19 }
  0x28   :  { %p818_p4 = por %p817_p3, %p816_p2 }
  0x2a   :  { %p819_p5 = pnand %p818_p4, %p812_p1 }
  0x2c   :  { %822 = shalt.err (!%p819_p5)
}
  0x2d   :  { %65 = dma.hbm_to_vmem [thread:$0]  %s1074_s5, 2048, %s60_s18, [#allocation9], %s852_s27, %s852_s27, %s853_s28  }
  0x2e   :  { %843 = dma.done.wait [#allocation3], 128  }
  0x2f   :  { %844 = vsyncadd [#allocation3], 4294967168 }
  0x30   :  { %845 = dma.done.wait [#allocation6], 2304  }
  0x31   :  { %846 = vsyncadd [#allocation6], 4294964992 }
  0x32   :  { %847 = dma.done.wait [#allocation9], 2048  }
  0x33   :  { %848 = vsyncadd [#allocation9], 4294965248  ;;  %v857_v0 = vmov 0.0   ;;  %vm858_vm0 = vmmov 0   ;;  %v82_v1 = vld [vmem:[#allocation5 + $0x8] sm:$0xff]  ;;  %v81_v2 = vld [vmem:[#allocation5] sm:$0xff] }
  0x34   :  { %587 = vmatprep.subr.mxu0 %v857_v0  ;;  %591 = vmatprep.mubr.msk.f32.mxu0 %vm858_vm0, %v857_v0  ;;  %v80_v3 = vld [vmem:[#allocation2] sm:$0xff]  ;;  %vm90_vm1 = vcmask 130048   ;;  %v927_v4 = vld [vmem:[#allocation7 + $0x78] sm:$0xff]  ;;  %v929_v5 = vld [vmem:[#allocation7 + $0x70] sm:$0xff]  ;;  %s859_s23 = smov [#allocation10]  }
  0x35   :  { %594 = vmatprep.subr.mxu1 %v857_v0  ;;  %626 = vmatprep.mubr.msk.f32.mxu1 %vm858_vm0, %v857_v0  ;;  %v934_v6 = vld [vmem:[#allocation7 + $0x68] sm:$0xff]  ;;  %v938_v7 = vld [vmem:[#allocation7 + $0x60] sm:$0xff]  ;;  %v944_v8 = vld [vmem:[#allocation7 + $0x58] sm:$0xff]  ;;  %s501_s24 = sshll.u32 %s859_s23, 4  ;;  %s502_s24 = int_to_ptr.vmem [resolvable:$true] %s501_s24 }
  0x36   :  { %588 = vmatpush3.msra.mxu0 %v82_v1  ;;  %595 = vmatpush3.msra.mxu1 %v927_v4  ;;  %v950_v9 = vld [vmem:[#allocation7 + $0x50] sm:$0xff]  ;;  %v956_v10 = vld [vmem:[#allocation7 + $0x48] sm:$0xff]  ;;  %v962_v11 = vld [vmem:[#allocation7 + $0x40] sm:$0xff]  ;;  %s823_s25 = scalar_lea.vmem %s502_s24, 128  ;;  %p828_p7 = scmp.lt.s32.totalorder %s502_s24, %s502_s24 }
  0x37   :  { %589 = vmatprep.subr.mxu0 %v857_v0  ;;  %596 = vmatprep.subr.mxu1 %v857_v0  ;;  %v968_v12 = vld [vmem:[#allocation7 + $0x38] sm:$0xff]  ;;  %v974_v13 = vld [vmem:[#allocation7 + $0x30] sm:$0xff]  ;;  %v980_v14 = vld [vmem:[#allocation7 + $0x28] sm:$0xff]  ;;  %p824_p6 = scmp.ne.s32.totalorder %s502_s24, %s823_s25  ;;  %p829_p8 = scmp.lt.s32.totalorder %s823_s25, %s823_s25 }
  0x38   :  { %590 = vmatpush3.msra.mxu0 %v81_v2  ;;  %597 = vmatpush3.msra.mxu1 %v929_v5  ;;  %v986_v15 = vld [vmem:[#allocation7 + $0x20] sm:$0xff]  ;;  %v168_v16 = vld [vmem:[#allocation7 + $0x18] sm:$0xff]  ;;  %v167_v17 = vld [vmem:[#allocation7 + $0x10] sm:$0xff] }
  0x39   :  { %592 = vmatmul.mubr.msk.f32.vlgmr.msra.gmra.mxu0 %vm90_vm1, %v80_v3  ;;  %598 = vmatprep.subr.mxu1 %v857_v0  ;;  %v166_v18 = vld [vmem:[#allocation7 + $0x8] sm:$0xff]  ;;  %v165_v19 = vld [vmem:[#allocation7] sm:$0xff]  ;;  %v416_v30 = vld [vmem:[#allocation8 + $0x78] sm:$0xff]  ;;  %p830_p9 = por %p829_p8, %p828_p7 }
  0x3a   :  { %629 = vmatprep.subr.mxu0 %v857_v0  ;;  %599 = vmatpush3.msra.mxu1 %v934_v6  ;;  %v512_v20 = vld [vmem:[%s1071_s2] ss:$0 sm:$0xff]  ;;  %v415_v31 = vld [vmem:[#allocation8 + $0x70] sm:$0xff]  ;;  %v413_v33 = vld [vmem:[#allocation8 + $0x60] sm:$0xff] }
  0x3b   :  { %630 = vmatpush3.msra.mxu0 %v927_v4  ;;  %600 = vmatprep.subr.mxu1 %v857_v0  ;;  %v514_v25 = vld [vmem:[%s1073_s4] ss:$0 sm:$0xff]  ;;  %v412_v34 = vld [vmem:[#allocation8 + $0x58] sm:$0xff]  ;;  %v411_v35 = vld [vmem:[#allocation8 + $0x50] sm:$0xff]  ;;  %p831_p10 = pnand %p830_p9, %p824_p6 }
  0x3c   :  { %631 = vmatprep.subr.mxu0 %v857_v0  ;;  %601 = vmatpush3.msra.mxu1 %v938_v7  ;;  %v414_v32 = vld [vmem:[#allocation8 + $0x68] sm:$0xff]  ;;  %v409_v37 = vld [vmem:[#allocation8 + $0x40] sm:$0xff]  ;;  %v408_v38 = vld [vmem:[#allocation8 + $0x38] sm:$0xff] }
  0x3d   :  { %632 = vmatpush3.msra.mxu0 %v929_v5  ;;  %602 = vmatprep.subr.mxu1 %v857_v0  ;;  %v410_v36 = vld [vmem:[#allocation8 + $0x48] sm:$0xff]  ;;  %v407_v39 = vld [vmem:[#allocation8 + $0x30] sm:$0xff]  ;;  %v405_v41 = vld [vmem:[#allocation8 + $0x20] sm:$0xff] }
  0x3e   :  { %633 = vmatprep.subr.mxu0 %v857_v0  ;;  %603 = vmatpush3.msra.mxu1 %v944_v8  ;;  %v406_v40 = vld [vmem:[#allocation8 + $0x28] sm:$0xff]  ;;  %v404_v42 = vld [vmem:[#allocation8 + $0x18] sm:$0xff]  ;;  %v403_v47 = vld [vmem:[#allocation8 + $0x10] sm:$0xff] }
  0x3f   :  { %634 = vmatpush3.msra.mxu0 %v934_v6  ;;  %604 = vmatprep.subr.mxu1 %v857_v0  ;;  %v402_v48 = vld [vmem:[#allocation8 + $0x8] sm:$0xff]  ;;  %v401_v49 = vld [vmem:[#allocation8] sm:$0xff] }
  0x40   :  { %635 = vmatprep.subr.mxu0 %v857_v0  ;;  %605 = vmatpush3.msra.mxu1 %v950_v9  ;;  %v515_v54 = vld [vmem:[%s1075_s6] ss:$0 sm:$0xff] }
  0x41   :  { %636 = vmatpush3.msra.mxu0 %v938_v7  ;;  %606 = vmatprep.subr.mxu1 %v857_v0 }
  0x42   :  { %637 = vmatprep.subr.mxu0 %v857_v0  ;;  %607 = vmatpush3.msra.mxu1 %v956_v10 }
  0x43   :  { %638 = vmatpush3.msra.mxu0 %v944_v8  ;;  %608 = vmatprep.subr.mxu1 %v857_v0 }
  0x44   :  { %639 = vmatprep.subr.mxu0 %v857_v0  ;;  %609 = vmatpush3.msra.mxu1 %v962_v11 }
  0x45   :  { %640 = vmatpush3.msra.mxu0 %v950_v9  ;;  %610 = vmatprep.subr.mxu1 %v857_v0 }
  0x46   :  { %641 = vmatprep.subr.mxu0 %v857_v0  ;;  %611 = vmatpush3.msra.mxu1 %v968_v12 }
  0x47   :  { %642 = vmatpush3.msra.mxu0 %v956_v10  ;;  %612 = vmatprep.subr.mxu1 %v857_v0 }
  0x48   :  { %643 = vmatprep.subr.mxu0 %v857_v0  ;;  %613 = vmatpush3.msra.mxu1 %v974_v13 }
  0x49   :  { %644 = vmatpush3.msra.mxu0 %v962_v11  ;;  %614 = vmatprep.subr.mxu1 %v857_v0 }
  0x4a   :  { %645 = vmatprep.subr.mxu0 %v857_v0  ;;  %615 = vmatpush3.msra.mxu1 %v980_v14 }
  0x4b   :  { %646 = vmatpush3.msra.mxu0 %v968_v12  ;;  %616 = vmatprep.subr.mxu1 %v857_v0 }
  0x4c   :  { %647 = vmatprep.subr.mxu0 %v857_v0  ;;  %617 = vmatpush3.msra.mxu1 %v986_v15 }
  0x4d   :  { %648 = vmatpush3.msra.mxu0 %v974_v13  ;;  %618 = vmatprep.subr.mxu1 %v857_v0 }
  0x4e   :  { %649 = vmatprep.subr.mxu0 %v857_v0  ;;  %619 = vmatpush3.msra.mxu1 %v168_v16 }
  0x4f   :  { %650 = vmatpush3.msra.mxu0 %v980_v14  ;;  %620 = vmatprep.subr.mxu1 %v857_v0 }
  0x50   :  { %651 = vmatprep.subr.mxu0 %v857_v0  ;;  %661 = vmatprep.mubr.msk.f32.mxu0 %vm858_vm0, %v857_v0 }
  0x51   :  { %652 = vmatpush3.msra.mxu0 %v986_v15  ;;  %621 = vmatpush3.msra.mxu1 %v167_v17 }
  0x52   :  { %653 = vmatprep.subr.mxu0 %v857_v0  ;;  %622 = vmatprep.subr.mxu1 %v857_v0 }
  0x53   :  { %654 = vmatpush3.msra.mxu0 %v168_v16  ;;  %623 = vmatpush3.msra.mxu1 %v166_v18 }
  0x54   :  { %655 = vmatprep.subr.mxu0 %v857_v0  ;;  %624 = vmatprep.subr.mxu1 %v857_v0 }
  0x55   :  { %656 = vmatpush3.msra.mxu0 %v167_v17  ;;  %625 = vmatpush3.msra.mxu1 %v165_v19 }
  0x56   :  { %657 = vmatprep.subr.mxu0 %v857_v0  ;;  %664 = vmatprep.subr.mxu1 %v857_v0 }
  0x57   :  { %658 = vmatpush3.msra.mxu0 %v166_v18 }
  0x58   :  { %659 = vmatprep.subr.mxu0 %v857_v0 }
  0x59   :  { %660 = vmatpush3.msra.mxu0 %v165_v19 }
  0x5a   :  { %699 = vmatprep.subr.mxu0 %v857_v0 }
  0xf9   :  { %v160_v21 = vpop.f32.mrf.mxu0 }
  0xfa   :  { %v161_v22 = vadd.f32 %v512_v20, %v160_v21 }
  0xfb   :  { %v593_v23 = vpop.f32.mrf.mxu0 }
  0xfc   :  { %v164_v24 = vmax.f32 %v161_v22, 0.0 }
  0xfe   :  { %627 = vmatmul.mubr.f32.vlgmr.msra.gmra.mxu1 %v164_v24 }
  0xff   :  { %665 = vmatpush3.msra.mxu1 %v927_v4  ;;  %696 = vmatprep.mubr.msk.f32.mxu1 %vm858_vm0, %v857_v0 }
 0x100   :  { %666 = vmatprep.subr.mxu1 %v857_v0 }
 0x101   :  { %667 = vmatpush3.msra.mxu1 %v929_v5 }
 0x102   :  { %668 = vmatprep.subr.mxu1 %v857_v0 }
 0x103   :  { %669 = vmatpush3.msra.mxu1 %v934_v6 }
 0x104   :  { %670 = vmatprep.subr.mxu1 %v857_v0 }
 0x105   :  { %671 = vmatpush3.msra.mxu1 %v938_v7 }
 0x106   :  { %672 = vmatprep.subr.mxu1 %v857_v0 }
 0x107   :  { %673 = vmatpush3.msra.mxu1 %v944_v8 }
 0x108   :  { %674 = vmatprep.subr.mxu1 %v857_v0 }
 0x109   :  { %675 = vmatpush3.msra.mxu1 %v950_v9 }
 0x10a   :  { %676 = vmatprep.subr.mxu1 %v857_v0 }
 0x10b   :  { %677 = vmatpush3.msra.mxu1 %v956_v10 }
 0x10c   :  { %678 = vmatprep.subr.mxu1 %v857_v0 }
 0x10d   :  { %679 = vmatpush3.msra.mxu1 %v962_v11 }
 0x10e   :  { %680 = vmatprep.subr.mxu1 %v857_v0 }
 0x10f   :  { %681 = vmatpush3.msra.mxu1 %v968_v12 }
 0x110   :  { %682 = vmatprep.subr.mxu1 %v857_v0 }
 0x111   :  { %683 = vmatpush3.msra.mxu1 %v974_v13 }
 0x112   :  { %684 = vmatprep.subr.mxu1 %v857_v0 }
 0x113   :  { %685 = vmatpush3.msra.mxu1 %v980_v14 }
 0x114   :  { %686 = vmatprep.subr.mxu1 %v857_v0 }
 0x115   :  { %687 = vmatpush3.msra.mxu1 %v986_v15 }
 0x116   :  { %688 = vmatprep.subr.mxu1 %v857_v0 }
 0x117   :  { %689 = vmatpush3.msra.mxu1 %v168_v16 }
 0x118   :  { %690 = vmatprep.subr.mxu1 %v857_v0 }
 0x119   :  { %691 = vmatpush3.msra.mxu1 %v167_v17 }
 0x11a   :  { %692 = vmatprep.subr.mxu1 %v857_v0 }
 0x11b   :  { %693 = vmatpush3.msra.mxu1 %v166_v18 }
 0x11c   :  { %694 = vmatprep.subr.mxu1 %v857_v0 }
 0x11d   :  { %695 = vmatpush3.msra.mxu1 %v165_v19 }
 0x1be   :  { %v254_v26 = vpop.f32.mrf.mxu1 }
 0x1bf   :  { %v255_v27 = vadd.f32 %v514_v25, %v254_v26 }
 0x1c0   :  { %v628_v28 = vpop.f32.mrf.mxu1 }
 0x1c1   :  { %v258_v29 = vmax.f32 %v255_v27, 0.0 }
 0x1c3   :  { %662 = vmatmul.mubr.f32.vlgmr.msra.gmra.mxu0 %v258_v29 }
 0x1c4   :  { %731 = vmatprep.mubr.msk.f32.mxu0 %vm858_vm0, %v857_v0  ;;  %700 = vmatpush3.msra.mxu0 %v416_v30 }
 0x1c5   :  { %701 = vmatprep.subr.mxu0 %v857_v0 }
 0x1c6   :  { %702 = vmatpush3.msra.mxu0 %v415_v31 }
 0x1c7   :  { %703 = vmatprep.subr.mxu0 %v857_v0 }
 0x1c8   :  { %704 = vmatpush3.msra.mxu0 %v414_v32 }
 0x1c9   :  { %705 = vmatprep.subr.mxu0 %v857_v0 }
 0x1ca   :  { %706 = vmatpush3.msra.mxu0 %v413_v33 }
 0x1cb   :  { %707 = vmatprep.subr.mxu0 %v857_v0 }
 0x1cc   :  { %708 = vmatpush3.msra.mxu0 %v412_v34 }
 0x1cd   :  { %709 = vmatprep.subr.mxu0 %v857_v0 }
 0x1ce   :  { %710 = vmatpush3.msra.mxu0 %v411_v35 }
 0x1cf   :  { %711 = vmatprep.subr.mxu0 %v857_v0 }
 0x1d0   :  { %712 = vmatpush3.msra.mxu0 %v410_v36 }
 0x1d1   :  { %713 = vmatprep.subr.mxu0 %v857_v0 }
 0x1d2   :  { %714 = vmatpush3.msra.mxu0 %v409_v37 }
 0x1d3   :  { %715 = vmatprep.subr.mxu0 %v857_v0 }
 0x1d4   :  { %716 = vmatpush3.msra.mxu0 %v408_v38 }
 0x1d5   :  { %717 = vmatprep.subr.mxu0 %v857_v0 }
 0x1d6   :  { %718 = vmatpush3.msra.mxu0 %v407_v39 }
 0x1d7   :  { %719 = vmatprep.subr.mxu0 %v857_v0 }
 0x1d8   :  { %720 = vmatpush3.msra.mxu0 %v406_v40 }
 0x1d9   :  { %721 = vmatprep.subr.mxu0 %v857_v0 }
 0x1da   :  { %722 = vmatpush3.msra.mxu0 %v405_v41 }
 0x1db   :  { %723 = vmatprep.subr.mxu0 %v857_v0 }
 0x1dc   :  { %724 = vmatpush3.msra.mxu0 %v404_v42 }
 0x1dd   :  { %725 = vmatprep.subr.mxu0 %v857_v0 }
 0x1de   :  { %726 = vmatpush3.msra.mxu0 %v403_v47 }
 0x1df   :  { %727 = vmatprep.subr.mxu0 %v857_v0 }
 0x1e0   :  { %728 = vmatpush3.msra.mxu0 %v402_v48 }
 0x1e1   :  { %729 = vmatprep.subr.mxu0 %v857_v0 }
 0x1e2   :  { %730 = vmatpush3.msra.mxu0 %v401_v49 }
 0x283   :  { %v325_v43 = vpop.f32.mrf.mxu0 }
 0x284   :  { %v326_v44 = vadd.f32 %v514_v25, %v325_v43 }
 0x285   :  { %v663_v45 = vpop.f32.mrf.mxu0 }
 0x286   :  { %v329_v46 = vmax.f32 %v326_v44, 0.0 }
 0x288   :  { %697 = vmatmul.mubr.f32.vlgmr.msra.gmra.mxu1 %v329_v46 }
 0x348   :  { %v396_v50 = vpop.f32.mrf.mxu1 }
 0x349   :  { %v397_v51 = vadd.f32 %v514_v25, %v396_v50 }
 0x34a   :  { %v698_v52 = vpop.f32.mrf.mxu1 }
 0x34b   :  { %v400_v53 = vmax.f32 %v397_v51, 0.0 }
 0x34d   :  { %732 = vmatmul.mubr.f32.vlgmr.msra.gmra.mxu0 %v400_v53 }
 0x40d   :  { %v490_v55 = vpop.f32.mrf.mxu0 }
 0x40e   :  { %v491_v56 = vadd.f32 %v515_v54, %v490_v55 }
 0x40f   :  { %v733_v57 = vpop.f32.mrf.mxu0 }
 0x410   :  { %494 = vst [vmem:[#allocation10] sm:$0xff] %v491_v56 }
 0x411   :  { %834 = shalt.err (!%p831_p10)
}
 0x412   :  { %504 = dma.vmem_to_hbm [thread:$0]  %s502_s24, 128, %s1076_s7, [#allocation4]  }
 0x413   :  { %849 = dma.done.wait [#allocation4], 128  }
 0x414   :  { %850 = vsyncadd [#allocation4], 4294967168 }
 0x415   :  { %508 = vsyncpa [#allocation3], 1 }
 0x416   :  { %509 = vsyncpa [#allocation6], 1 }
 0x417   :  { %510 = vsyncpa [#allocation9], 1 }
 0x418   :  { %511 = vsyncpa [#allocation4], 1 }

</bundles_post_ra>
